<compile_context>
chip_gen: v7x
topology: tpu7x:2x2x1
jax: 0.10.0
libtpu: 0.0.40
codegen_flags: <defaults>
</compile_context>

<pallas_src>
import jax
import jax.numpy as jnp
from jax.experimental import pallas as pl
from jax.experimental.pallas import tpu as pltpu


_MAX_BLOCK_BYTES = 8 * 1024 * 1024        # per-buffer hard cap (4 bufs -> 32 MiB)
_VMEM_LIMIT_BYTES = 48 * 1024 * 1024      # <= physical VMEM on all generations
_TWO_CORE_SPLIT_MIN_BYTES = 1 * 1024 * 1024


def _hsigmoid_kernel(x_ref, o_ref):
    x = x_ref[...]
    # relu6(x + 3) / 6 in the input dtype (weak-typed constants don't promote
    # bf16 -> f32). Divide by 6.0 exactly like PyTorch / the reference.
    o_ref[...] = (jnp.clip(x + 3.0, 0.0, 6.0) / 6.0).astype(o_ref.dtype)


def _default_target_block_bytes():
    """Per-generation block-size target (review: 6-8 MiB on v6e/v7x, ~3 MiB on v5e)."""
    try:
        kind = jax.devices()[0].device_kind.lower()
    except Exception:
        kind = ""
    if "v6" in kind or "v7" in kind:
        return 8 * 1024 * 1024
    return 3 * 1024 * 1024


def _choose_block_shape(shape, itemsize, target_bytes):
    """Grow the block from the minor dims outward up to ~target_bytes.

    Last dim is kept full (lane-dense) unless a single row alone exceeds the
    target; partial minor-dim blocks honor the (8, 128) divisibility rule.
    """
    nd = len(shape)
    target_elems = max(128, target_bytes // itemsize)
    block = [1] * nd

    w = shape[-1]
    if w <= target_elems:
        block[-1] = w
        full = True
    else:
        block[-1] = max(128, (target_elems // 128) * 128)
        full = block[-1] >= w
    covered = block[-1]

    for d in range(nd - 2, -1, -1):
        if not full:
            break
        dim = shape[d]
        if covered * dim <= target_elems:
            block[d] = dim
        else:
            want = max(1, target_elems // covered)
            if d == nd - 2:
                want = max(8, (want // 8) * 8)   # partial second-minor: multiple of 8
            if want >= dim:
                block[d] = dim
            else:
                block[d] = want
                full = False
        covered *= block[d]
    return tuple(block)


def _clamp_block(shape, block, itemsize, max_bytes):
    """Ensure the block never exceeds max_bytes (VMEM safety), shrinking legally."""
    block = list(block)
    nd = len(shape)

    def nbytes(b):
        n = itemsize
        for v in b:
            n *= v
        return n

    while nbytes(block) > max_bytes:
        shrunk = False
        for d in range(nd):
            full = shape[d]
            b = block[d]
            if d == nd - 1:
                lo = 128 if full >= 128 else full
            elif d == nd - 2:
                lo = 8 if full >= 8 else full
            else:
                lo = 1
            if b > lo:
                nb = max(lo, b // 2)
                if d == nd - 1 and nb != full:
                    nb = max(128, (nb // 128) * 128)
                if d == nd - 2 and nb != full:
                    nb = max(8, (nb // 8) * 8)
                block[d] = nb
                shrunk = True
                break
        if not shrunk:
            break
    return tuple(block)


def _split_block_for_two_cores(shape, block):
    """Halve one block dim so the grid has >= 2 steps (v7x megacore sharding)."""
    block = list(block)
    nd = len(shape)
    # Prefer leading dims (no alignment constraints), outermost first.
    for d in range(max(nd - 2, 0)):
        if block[d] >= 2:
            block[d] = -(-block[d] // 2)
            return tuple(block)
    if nd >= 2 and block[-2] >= 16:
        half = -(-block[-2] // 2)
        block[-2] = -(-half // 8) * 8
        return tuple(block)
    if block[-1] >= 256 and shape[-1] >= 256:
        half = -(-block[-1] // 2)
        block[-1] = -(-half // 128) * 128
        return tuple(block)
    return tuple(block)


def hsigmoid(x, *, target_block_bytes=None, donate=False):
    """Elementwise hard-sigmoid via Pallas, indexing the N-D input in place."""
    if x.size == 0:
        return x
    if x.ndim == 0:
        # Trivial scalar: route through a (1, 1) view (layout-free for 0-d).
        return hsigmoid(jnp.reshape(x, (1, 1)),
                        target_block_bytes=target_block_bytes)[0, 0]

    shape = x.shape
    nd = len(shape)
    itemsize = jnp.dtype(x.dtype).itemsize
    total_bytes = x.size * itemsize

    if target_block_bytes is None:
        target_block_bytes = _default_target_block_bytes()
    target_block_bytes = min(target_block_bytes, _MAX_BLOCK_BYTES)

    block = _choose_block_shape(shape, itemsize, target_block_bytes)
    block = _clamp_block(shape, block, itemsize, _MAX_BLOCK_BYTES)
    grid = tuple(pl.cdiv(s, b) for s, b in zip(shape, block))

    # Give v7x's two TensorCores something to shard when a mid-size input
    # would otherwise fit in a single block.
    if all(g == 1 for g in grid) and total_bytes >= _TWO_CORE_SPLIT_MIN_BYTES:
        block = _split_block_for_two_cores(shape, block)
        grid = tuple(pl.cdiv(s, b) for s, b in zip(shape, block))

    index_map = lambda *idx: idx
    in_spec = pl.BlockSpec(block, index_map)
    out_spec = pl.BlockSpec(block, index_map)

    cost = pl.CostEstimate(
        flops=4 * x.size,                 # add + clamp + div (advisory)
        transcendentals=0,
        bytes_accessed=2 * total_bytes,   # pure streaming: read + write
    )

    return pl.pallas_call(
        _hsigmoid_kernel,
        out_shape=jax.ShapeDtypeStruct(shape, x.dtype),
        grid_spec=pltpu.PrefetchScalarGridSpec(
            num_scalar_prefetch=0,
            grid=grid,
            in_specs=[in_spec],
            out_specs=out_spec,
        ),
        compiler_params=pltpu.CompilerParams(
            dimension_semantics=("parallel",) * nd,
            vmem_limit_bytes=_VMEM_LIMIT_BYTES,
        ),
        cost_estimate=cost,
        input_output_aliases=({0: 0} if donate else {}),
    )(x)


def hsigmoid_ref(x):
    # Pure-JAX reference (same formula as PyTorch relu6(x + 3) / 6).
    return jnp.clip(x + 3.0, 0.0, 6.0) / 6.0


if __name__ == "__main__":
    key = jax.random.PRNGKey(0)
    # NCHW input, consistent with conv-style module usage.
    x = jax.random.normal(key, (2, 4, 16, 16), dtype=jnp.float32) * 4.0

    y = hsigmoid(x)
    y = jax.block_until_ready(y)

    y_ref = hsigmoid_ref(x)
    assert y.shape == x.shape and y.dtype == x.dtype
    assert jnp.allclose(y, y_ref, atol=1e-6, rtol=1e-6)

    print("KERNEL_OK")
</pallas_src>

<mosaic_0001>
module attributes {stable_mosaic.version = 11 : i64} {
  func.func @_hsigmoid_kernel(%arg0: i32, %arg1: i32, %arg2: i32, %arg3: i32, %arg4: memref<2x4x16x16xf32, #tpu.memory_space<vmem>>, %arg5: memref<2x4x16x16xf32, #tpu.memory_space<vmem>>) attributes {dimension_semantics = [#tpu.dimension_semantics<parallel>, #tpu.dimension_semantics<parallel>, #tpu.dimension_semantics<parallel>, #tpu.dimension_semantics<parallel>], iteration_bounds = array<i64: 1, 1, 1, 1>, scalar_prefetch = 0 : i64, scratch_operands = 0 : i64, tpu.core_type = #tpu.core_type<tc>, window_params = [{transform_indices = @transform_0, window_bounds = array<i64: 2, 4, 16, 16>}, {transform_indices = @transform_1, window_bounds = array<i64: 2, 4, 16, 16>}]} {
    %c0 = arith.constant 0 : index
    %c0_0 = arith.constant 0 : index
    %c0_1 = arith.constant 0 : index
    %c0_2 = arith.constant 0 : index
    %0 = vector.load %arg4[%c0, %c0_0, %c0_1, %c0_2] : memref<2x4x16x16xf32, #tpu.memory_space<vmem>>, vector<2x4x16x16xf32>
    %cst = arith.constant 3.000000e+00 : f32
    %1 = vector.broadcast %cst : f32 to vector<2x4x16x16xf32>
    %2 = arith.addf %0, %1 : vector<2x4x16x16xf32>
    %cst_3 = arith.constant 0.000000e+00 : f32
    %cst_4 = arith.constant 6.000000e+00 : f32
    %3 = vector.broadcast %cst_3 : f32 to vector<2x4x16x16xf32>
    %4 = arith.maximumf %3, %2 : vector<2x4x16x16xf32>
    %5 = vector.broadcast %cst_4 : f32 to vector<2x4x16x16xf32>
    %6 = arith.minimumf %5, %4 : vector<2x4x16x16xf32>
    %cst_5 = arith.constant 6.000000e+00 : f32
    %7 = vector.broadcast %cst_5 : f32 to vector<2x4x16x16xf32>
    %8 = arith.divf %6, %7 : vector<2x4x16x16xf32>
    %c0_6 = arith.constant 0 : index
    %c0_7 = arith.constant 0 : index
    %c0_8 = arith.constant 0 : index
    %c0_9 = arith.constant 0 : index
    %9 = vector.load %arg5[%c0_6, %c0_7, %c0_8, %c0_9] : memref<2x4x16x16xf32, #tpu.memory_space<vmem>>, vector<2x4x16x16xf32>
    tpu.vector_store %arg5[%c0_6, %c0_7, %c0_8, %c0_9], %8 {strides = array<i32>} : memref<2x4x16x16xf32, #tpu.memory_space<vmem>>, vector<2x4x16x16xf32>,
    return
  }
  func.func @transform_0(%arg0: i32, %arg1: i32, %arg2: i32, %arg3: i32) -> (i32, i32, i32, i32) {
    %c0_i32 = arith.constant 0 : i32
    return %arg0, %arg1, %arg2, %arg3 : i32, i32, i32, i32
  }
  func.func @transform_1(%arg0: i32, %arg1: i32, %arg2: i32, %arg3: i32) -> (i32, i32, i32, i32) {
    %c0_i32 = arith.constant 0 : i32
    return %arg0, %arg1, %arg2, %arg3 : i32, i32, i32, i32
  }
}

</mosaic_0001>

<bundles_post_ra>
// kernel: tpu_custom_call.1
= control target key start
LH: loop header
LB: loop body
LE: loop exit
PB: predicated region body
PF: predicated region fallthrough
CT: control target
= control target key end

     0   :  { %6 = vsyncpa [#allocation3], 0  ;;  %s250_s0 = inlined_call_operand.hbm [shape: f32[2,4,16,16], index: 0, kind: input, shape index: {}]   ;;  %s251_s1 = inlined_call_operand.hbm [shape: f32[2,4,16,16], index: 1, kind: output, shape index: {}]  }
   0x1   :  { %7 = vsyncpa [#allocation4], 0  ;;  %s190_s6 = smov [#allocation2]   ;;  %s142_s10 = scalar_lea.hbm %s250_s0, 2048 }
   0x2   :  { %s13_s7 = sshll.u32 %s190_s6, 4  ;;  %p143_p0 = scmp.ne.s32.totalorder %s250_s0, %s142_s10  ;;  %s14_s7 = int_to_ptr.vmem [resolvable:$true] %s13_s7 }
   0x3   :  { %p146_p1 = scmp.lt.u32.totalorder %s142_s10, %s250_s0 }
   0x5   :  { %p148_p2 = pnand %p146_p1, %p143_p0 }
   0x7   :  { %151 = shalt.err (!%p148_p2)
}
   0x8   :  { %s152_s15 = scalar_lea.vmem %s14_s7, 2048  ;;  %p157_p4 = scmp.lt.s32.totalorder %s14_s7, %s14_s7 }
   0x9   :  { %p153_p3 = scmp.ne.s32.totalorder %s14_s7, %s152_s15  ;;  %p158_p5 = scmp.lt.s32.totalorder %s152_s15, %s152_s15 }
   0xb   :  { %p159_p6 = por %p158_p5, %p157_p4 }
   0xd   :  { %p160_p7 = pnand %p159_p6, %p153_p3 }
   0xf   :  { %163 = shalt.err (!%p160_p7)
}
  0x10   :  { %s191_s16 = smov 128   ;;  %s192_s17 = smov 8  }
  0x11   :  { %19 = dma.hbm_to_vmem [thread:$0]  %s250_s0, 2048, %s14_s7, [#allocation3], %s191_s16, %s191_s16, %s192_s17  }
  0x12   :  { %186 = dma.done.wait [#allocation3], 2048  }
  0x13   :  { %187 = vsyncadd [#allocation3], 4294965248  ;;  %v23_v0 = vld [vmem:[#allocation2] sm:$0xff]  ;;  %v24_v1 = vld [vmem:[#allocation2 + $0x8] sm:$0xff]  ;;  %vm104_vm0 = vcmask 130048   ;;  %s193_s0 = smov [#allocation5]  }
  0x14   :  { %v25_v2 = vld [vmem:[#allocation2 + $0x10] sm:$0xff]  ;;  %v39_v3 = vadd.f32 3.0, %v23_v0  ;;  %v40_v4 = vadd.f32 3.0, %v24_v1  ;;  %v26_v6 = vld [vmem:[#allocation2 + $0x18] sm:$0xff]  ;;  %v27_v7 = vld [vmem:[#allocation2 + $0x20] sm:$0xff]  ;;  %s126_s20 = sshll.u32 %s193_s0, 4  ;;  %s127_s20 = int_to_ptr.vmem [resolvable:$true] %s126_s20 }
  0x15   :  { %v41_v5 = vadd.f32 3.0, %v25_v2  ;;  %v28_v8 = vld [vmem:[#allocation2 + $0x28] sm:$0xff]  ;;  %v42_v9 = vadd.f32 3.0, %v26_v6  ;;  %v43_v10 = vadd.f32 3.0, %v27_v7  ;;  %v29_v12 = vld [vmem:[#allocation2 + $0x30] sm:$0xff]  ;;  %v30_v13 = vld [vmem:[#allocation2 + $0x38] sm:$0xff]  ;;  %p169_p9 = scmp.lt.s32.totalorder %s127_s20, %s127_s20 }
  0x16   :  { %v44_v11 = vadd.f32 3.0, %v28_v8  ;;  %v55_v14 = vmax.f32 %v39_v3, 0.0  ;;  %v56_v15 = vmax.f32 %v40_v4, 0.0  ;;  %v45_v17 = vadd.f32 3.0, %v29_v12  ;;  %v31_v22 = vld [vmem:[#allocation2 + $0x40] sm:$0xff]  ;;  %v32_v23 = vld [vmem:[#allocation2 + $0x48] sm:$0xff] }
  0x17   :  { %v57_v16 = vmax.f32 %v41_v5, 0.0  ;;  %v58_v18 = vmax.f32 %v42_v9, 0.0  ;;  %v59_v19 = vmax.f32 %v43_v10, 0.0  ;;  %v46_v21 = vadd.f32 3.0, %v30_v13  ;;  %v33_v28 = vld [vmem:[#allocation2 + $0x50] sm:$0xff]  ;;  %v34_v29 = vld [vmem:[#allocation2 + $0x58] sm:$0xff] }
  0x18   :  { %v60_v20 = vmax.f32 %v44_v11, 0.0  ;;  %v71_v24 = vmin.f32 %v55_v14, 6.0  ;;  %v72_v25 = vmin.f32 %v56_v15, 6.0  ;;  %v61_v27 = vmax.f32 %v45_v17, 0.0  ;;  %v35_v34 = vld [vmem:[#allocation2 + $0x60] sm:$0xff]  ;;  %v36_v35 = vld [vmem:[#allocation2 + $0x68] sm:$0xff] }
  0x19   :  { %v73_v26 = vmin.f32 %v57_v16, 6.0  ;;  %v74_v30 = vmin.f32 %v58_v18, 6.0  ;;  %v75_v31 = vmin.f32 %v59_v19, 6.0  ;;  %v62_v33 = vmax.f32 %v46_v21, 0.0  ;;  %v37_v50 = vld [vmem:[#allocation2 + $0x70] sm:$0xff]  ;;  %v38_v51 = vld [vmem:[#allocation2 + $0x78] sm:$0xff] }
  0x1a   :  { %v76_v32 = vmin.f32 %v60_v20, 6.0  ;;  %v88_v36 = vmul.f32 0.16666667, %v71_v24  ;;  %v89_v37 = vmul.f32 0.16666667, %v72_v25  ;;  %v77_v42 = vmin.f32 %v61_v27, 6.0 }
  0x1b   :  { %v90_v38 = vmul.f32 0.16666667, %v73_v26  ;;  %v91_v39 = vmul.f32 0.16666667, %v74_v30  ;;  %v92_v40 = vmul.f32 0.16666667, %v75_v31 }
  0x1c   :  { %v93_v41 = vmul.f32 0.16666667, %v76_v32  ;;  %105 = vst.msk [vmem:[#allocation5] sm:$0xff] %vm104_vm0, %v88_v36  ;;  %106 = vst.msk [vmem:[#allocation5 + $0x8] sm:$0xff] %vm104_vm0, %v89_v37  ;;  %v78_v43 = vmin.f32 %v62_v33, 6.0  ;;  %v47_v44 = vadd.f32 3.0, %v31_v22 }
  0x1d   :  { %107 = vst.msk [vmem:[#allocation5 + $0x10] sm:$0xff] %vm104_vm0, %v90_v38  ;;  %v48_v45 = vadd.f32 3.0, %v32_v23  ;;  %108 = vst.msk [vmem:[#allocation5 + $0x18] sm:$0xff] %vm104_vm0, %v91_v39  ;;  %v49_v46 = vadd.f32 3.0, %v33_v28  ;;  %v50_v47 = vadd.f32 3.0, %v34_v29  ;;  %v51_v48 = vadd.f32 3.0, %v35_v34 }
  0x1e   :  { %109 = vst.msk [vmem:[#allocation5 + $0x20] sm:$0xff] %vm104_vm0, %v92_v40  ;;  %110 = vst.msk [vmem:[#allocation5 + $0x28] sm:$0xff] %vm104_vm0, %v93_v41  ;;  %v52_v49 = vadd.f32 3.0, %v36_v35  ;;  %v94_v52 = vmul.f32 0.16666667, %v77_v42  ;;  %v63_v54 = vmax.f32 %v47_v44, 0.0 }
  0x1f   :  { %v95_v53 = vmul.f32 0.16666667, %v78_v43  ;;  %v64_v55 = vmax.f32 %v48_v45, 0.0  ;;  %v65_v56 = vmax.f32 %v49_v46, 0.0  ;;  %v66_v57 = vmax.f32 %v50_v47, 0.0  ;;  %s164_s21 = scalar_lea.vmem %s127_s20, 2048 }
  0x20   :  { %v67_v58 = vmax.f32 %v51_v48, 0.0  ;;  %v68_v59 = vmax.f32 %v52_v49, 0.0  ;;  %111 = vst.msk [vmem:[#allocation5 + $0x30] sm:$0xff] %vm104_vm0, %v94_v52  ;;  %v79_v60 = vmin.f32 %v63_v54, 6.0  ;;  %v53_v62 = vadd.f32 3.0, %v37_v50  ;;  %p165_p8 = scmp.ne.s32.totalorder %s127_s20, %s164_s21  ;;  %p170_p10 = scmp.lt.s32.totalorder %s164_s21, %s164_s21 }
  0x21   :  { %112 = vst.msk [vmem:[#allocation5 + $0x38] sm:$0xff] %vm104_vm0, %v95_v53  ;;  %v80_v61 = vmin.f32 %v64_v55, 6.0  ;;  %v54_v63 = vadd.f32 3.0, %v38_v51  ;;  %v81_v0 = vmin.f32 %v65_v56, 6.0  ;;  %v82_v1 = vmin.f32 %v66_v57, 6.0 }
  0x22   :  { %v83_v2 = vmin.f32 %v67_v58, 6.0  ;;  %v84_v3 = vmin.f32 %v68_v59, 6.0  ;;  %v96_v4 = vmul.f32 0.16666667, %v79_v60  ;;  %v69_v6 = vmax.f32 %v53_v62, 0.0  ;;  %p171_p11 = por %p170_p10, %p169_p9 }
  0x23   :  { %v97_v5 = vmul.f32 0.16666667, %v80_v61  ;;  %v70_v7 = vmax.f32 %v54_v63, 0.0  ;;  %v98_v8 = vmul.f32 0.16666667, %v81_v0 }
  0x24   :  { %v99_v9 = vmul.f32 0.16666667, %v82_v1  ;;  %v100_v10 = vmul.f32 0.16666667, %v83_v2  ;;  %113 = vst.msk [vmem:[#allocation5 + $0x40] sm:$0xff] %vm104_vm0, %v96_v4  ;;  %v85_v12 = vmin.f32 %v69_v6, 6.0  ;;  %p172_p12 = pnand %p171_p11, %p165_p8 }
  0x25   :  { %114 = vst.msk [vmem:[#allocation5 + $0x48] sm:$0xff] %vm104_vm0, %v97_v5  ;;  %v101_v11 = vmul.f32 0.16666667, %v84_v3  ;;  %v86_v13 = vmin.f32 %v70_v7, 6.0  ;;  %115 = vst.msk [vmem:[#allocation5 + $0x50] sm:$0xff] %vm104_vm0, %v98_v8 }
  0x26   :  { %116 = vst.msk [vmem:[#allocation5 + $0x58] sm:$0xff] %vm104_vm0, %v99_v9  ;;  %117 = vst.msk [vmem:[#allocation5 + $0x60] sm:$0xff] %vm104_vm0, %v100_v10  ;;  %v102_v14 = vmul.f32 0.16666667, %v85_v12 }
  0x27   :  { %118 = vst.msk [vmem:[#allocation5 + $0x68] sm:$0xff] %vm104_vm0, %v101_v11  ;;  %v103_v15 = vmul.f32 0.16666667, %v86_v13 }
  0x28   :  { %119 = vst.msk [vmem:[#allocation5 + $0x70] sm:$0xff] %vm104_vm0, %v102_v14 }
  0x29   :  { %120 = vst.msk [vmem:[#allocation5 + $0x78] sm:$0xff] %vm104_vm0, %v103_v15 }
  0x2a   :  { %175 = shalt.err (!%p172_p12)
}
  0x2b   :  { %s176_s24 = scalar_lea.hbm %s251_s1, 2048 }
  0x2c   :  { %p177_p13 = scmp.ne.s32.totalorder %s251_s1, %s176_s24  ;;  %p180_p0 = scmp.lt.u32.totalorder %s176_s24, %s251_s1 }
  0x2e   :  { %p182_p1 = pnand %p180_p0, %p177_p13 }
  0x30   :  { %185 = shalt.err (!%p182_p1)
}
  0x31   :  { %132 = dma.vmem_to_hbm [thread:$0]  %s127_s20, 2048, %s251_s1, [#allocation4], %s191_s16, %s191_s16, %s192_s17  }
  0x32   :  { %188 = dma.done.wait [#allocation4], 2048  }
  0x33   :  { %189 = vsyncadd [#allocation4], 4294965248 }
  0x34   :  { %136 = vsyncpa [#allocation3], 1 }
  0x35   :  { %137 = vsyncpa [#allocation4], 1 }

</bundles_post_ra>
